<compile_context>
chip_gen: v7x
topology: tpu7x:2x2x1
jax: 0.10.0
libtpu: 0.0.40
codegen_flags: <defaults>
</compile_context>

<pallas_src>
import functools

import jax
import jax.numpy as jnp
from jax.experimental import pallas as pl
from jax.experimental.pallas import tpu as pltpu

D_MODEL = 32
N_HEADS = 4
D_FF = 64
SEQ = 8
BATCH = 2
EPS = 1e-5  # nn.LayerNorm default


def _layer_norm(x, gamma, beta):
    mean = jnp.mean(x, axis=-1, keepdims=True)
    var = jnp.mean(jnp.square(x - mean), axis=-1, keepdims=True)
    inv = jax.lax.rsqrt(var + EPS)
    return (x - mean) * inv * gamma + beta


def encoder_layer_kernel(
    x_ref,          # (M, D)  flattened (bt * S, D) slab for this grid step
    wqkv_ref,       # (D, 3D) fused [Wq*scale | Wk | Wv]
    bqkv_ref,       # (1, 3D) fused [bq*scale | bk | bv]  (f32)
    wo_ref,         # (D, D)
    w1_ref,         # (D, F)
    b1_ref,         # (1, F)  (f32)
    w2_ref,         # (F, D)
    vecs_ref,       # (6, D)  rows: bo, gamma1, beta1, b2, gamma2, beta2 (f32)
    o_ref,          # (M, D)
    *, n_heads, seq, compute_dtype,
):
    xf = x_ref[...]                       # (M, D) f32
    M, D = xf.shape
    bt = M // seq                         # batch elements folded in this step
    dh = D // n_heads
    cd = compute_dtype                    # MXU operand dtype (f32 or bf16)

    vecs = vecs_ref[...]
    bo, g1, be1, b2, g2, be2 = (vecs[i:i + 1] for i in range(6))

    # ---- Fused QKV projection: one MXU matmul (1/sqrt(dh) folded into Q cols) ----
    qkv = jnp.dot(xf.astype(cd), wqkv_ref[...],
                  preferred_element_type=jnp.float32) + bqkv_ref[...]   # (M, 3D) f32

    # ---- Fold (head, batch) into ONE leading batch dim: (n_heads*bt, seq, dh).
    # Only static lane slices, leading-dim reshapes and axis-0 concatenation are
    # used (no minor-dim transposes), so lowering stays on proven op types.
    def to_heads(col0):
        return jnp.concatenate(
            [qkv[:, col0 + h * dh: col0 + (h + 1) * dh].reshape(bt, seq, dh)
             for h in range(n_heads)],
            axis=0)

    q = to_heads(0)          # (nh*bt, seq, dh)
    k = to_heads(D)
    v = to_heads(2 * D)

    # ---- Attention: one batched contraction for scores, one for context ----
    s = jnp.einsum("bqd,bkd->bqk", q.astype(cd), k.astype(cd),
                   preferred_element_type=jnp.float32)          # (nh*bt, seq, seq)
    s = s - jnp.max(s, axis=-1, keepdims=True)
    e = jnp.exp(s)
    inv = pl.reciprocal(jnp.sum(e, axis=-1, keepdims=True), approx=True)  # EUP
    ctx = jnp.einsum("bqk,bkd->bqd", e.astype(cd), v.astype(cd),
                     preferred_element_type=jnp.float32) * inv  # (nh*bt, seq, dh)

    # ---- Output projection without a lane concatenate: accumulate per head ----
    wo = wo_ref[...]
    attn = bo                                                   # (1, D) broadcast
    for h in range(n_heads):                                    # static, tiny
        ctx_h = ctx[h * bt:(h + 1) * bt].reshape(M, dh)
        attn = attn + jnp.dot(ctx_h.astype(cd), wo[h * dh:(h + 1) * dh, :],
                              preferred_element_type=jnp.float32)

    # ---- residual1 + norm1 (dropout = identity); LayerNorm always f32 ----
    x1 = _layer_norm(xf + attn, g1, be1)

    # ---- Feed-forward: Linear -> ReLU -> Linear ----
    h1 = jnp.dot(x1.astype(cd), w1_ref[...],
                 preferred_element_type=jnp.float32) + b1_ref[...]
    h1 = jnp.maximum(h1, 0.0)
    ff = jnp.dot(h1.astype(cd), w2_ref[...],
                 preferred_element_type=jnp.float32) + b2

    # ---- residual2 + norm2 ----
    o_ref[...] = _layer_norm(x1 + ff, g2, be2).astype(o_ref.dtype)


def _num_batch_blocks(batch, seq, *, min_rows_per_core=256):
    """Split the folded slab across 2 TensorCores only when each core gets
    enough matmul rows to amortise the per-grid-step overhead.  Gated on
    rows-per-core first; device-kind sniffing is only a secondary check."""
    if batch % 2 != 0:
        return 1
    rows_per_core = (batch // 2) * seq
    if rows_per_core < min_rows_per_core or rows_per_core % 8 != 0:
        return 1
    try:
        kind = jax.devices()[0].device_kind.lower()
    except Exception:
        return 1
    return 2 if "v7" in kind else 1


def encoder_layer(x, params, *, n_heads=N_HEADS, num_batch_blocks=None,
                  matmul_dtype=jnp.float32):
    B, S, D = x.shape
    nb = _num_batch_blocks(B, S) if num_batch_blocks is None else num_batch_blocks
    assert B % nb == 0
    M = (B // nb) * S                       # rows per grid step

    # ---- one-time parameter packing (wrapper-side, negligible cost) ----
    wd = matmul_dtype                       # MXU operand dtype for weights
    scale = 1.0 / jnp.sqrt(jnp.float32(D // n_heads))
    wqkv = jnp.concatenate([params["wq"] * scale, params["wk"], params["wv"]],
                           axis=1).astype(wd)                     # (D, 3D)
    bqkv = jnp.concatenate([params["bq"] * scale, params["bk"], params["bv"]],
                           axis=1)                                # (1, 3D) f32
    vecs = jnp.concatenate(
        [params["bo"], params["g1"], params["be1"],
         params["b2"], params["g2"], params["be2"]], axis=0)      # (6, D) f32

    weight_args = [wqkv, bqkv, params["wo"].astype(wd),
                   params["w1"].astype(wd), params["b1"],
                   params["w2"].astype(wd), vecs]

    def wspec(w):
        # Whole-array block, resident across the (parallel) batch grid.
        return pl.BlockSpec(w.shape, lambda b, _nd=w.ndim: (0,) * _nd)

    xf = x.reshape(B * S, D)

    out = pl.pallas_call(
        functools.partial(encoder_layer_kernel, n_heads=n_heads, seq=S,
                          compute_dtype=matmul_dtype),
        out_shape=jax.ShapeDtypeStruct((B * S, D), jnp.float32),
        grid_spec=pltpu.PrefetchScalarGridSpec(
            num_scalar_prefetch=0,
            grid=(nb,),
            in_specs=[pl.BlockSpec((M, D), lambda b: (b, 0))]
                     + [wspec(w) for w in weight_args],
            out_specs=pl.BlockSpec((M, D), lambda b: (b, 0)),
        ),
        compiler_params=pltpu.CompilerParams(
            dimension_semantics=("parallel",)),
    )(xf, *weight_args)
    return out.reshape(B, S, D)


def init_params(key, d_model=D_MODEL, d_ff=D_FF):
    ks = jax.random.split(key, 6)
    scale = 0.05

    def w(k, shape):
        return (scale * jax.random.normal(k, shape)).astype(jnp.float32)

    # Weights stored as [in, out] (already transposed vs. torch Linear).
    return {
        "wq": w(ks[0], (d_model, d_model)), "bq": jnp.zeros((1, d_model), jnp.float32),
        "wk": w(ks[1], (d_model, d_model)), "bk": jnp.zeros((1, d_model), jnp.float32),
        "wv": w(ks[2], (d_model, d_model)), "bv": jnp.zeros((1, d_model), jnp.float32),
        "wo": w(ks[3], (d_model, d_model)), "bo": jnp.zeros((1, d_model), jnp.float32),
        "g1": jnp.ones((1, d_model), jnp.float32), "be1": jnp.zeros((1, d_model), jnp.float32),
        "w1": w(ks[4], (d_model, d_ff)), "b1": jnp.zeros((1, d_ff), jnp.float32),
        "w2": w(ks[5], (d_ff, d_model)), "b2": jnp.zeros((1, d_model), jnp.float32),
        "g2": jnp.ones((1, d_model), jnp.float32), "be2": jnp.zeros((1, d_model), jnp.float32),
    }


def reference(x, p, n_heads=N_HEADS):
    B, S, D = x.shape
    dh = D // n_heads

    def ln(v, g, b):
        m = jnp.mean(v, -1, keepdims=True)
        var = jnp.mean(jnp.square(v - m), -1, keepdims=True)
        return (v - m) * jax.lax.rsqrt(var + EPS) * g + b

    q = x @ p["wq"] + p["bq"]
    k = x @ p["wk"] + p["bk"]
    v = x @ p["wv"] + p["bv"]
    q = q.reshape(B, S, n_heads, dh).transpose(0, 2, 1, 3)
    k = k.reshape(B, S, n_heads, dh).transpose(0, 2, 1, 3)
    v = v.reshape(B, S, n_heads, dh).transpose(0, 2, 1, 3)
    s = jnp.einsum("bhqd,bhkd->bhqk", q, k) / jnp.sqrt(jnp.float32(dh))
    a = jax.nn.softmax(s, axis=-1)
    o = jnp.einsum("bhqk,bhkd->bhqd", a, v).transpose(0, 2, 1, 3).reshape(B, S, D)
    o = o @ p["wo"] + p["bo"]
    x1 = ln(x + o, p["g1"], p["be1"])
    ff = jnp.maximum(x1 @ p["w1"] + p["b1"], 0.0) @ p["w2"] + p["b2"]
    return ln(x1 + ff, p["g2"], p["be2"])


if __name__ == "__main__":
    key = jax.random.PRNGKey(0)
    kx, kp = jax.random.split(key)
    x = jax.random.normal(kx, (BATCH, SEQ, D_MODEL), dtype=jnp.float32)
    params = init_params(kp)

    out = jax.block_until_ready(encoder_layer(x, params))
    ref = reference(x, params)

    assert out.shape == (BATCH, SEQ, D_MODEL)
    # Tolerance budgets the approximate EUP reciprocal (~2^-12 rel err) in the
    # softmax normalisation; everything else is exact-f32 vs the reference.
    err = float(jnp.max(jnp.abs(out - ref)))
    assert jnp.allclose(out, ref, atol=2e-4, rtol=2e-4), err
    print("KERNEL_OK")
</pallas_src>

<mosaic_0001>
module attributes {stable_mosaic.version = 11 : i64} {
  func.func @encoder_layer_kernel(%arg0: i32, %arg1: memref<16x32xf32, #tpu.memory_space<vmem>>, %arg2: memref<32x96xf32, #tpu.memory_space<vmem>>, %arg3: memref<1x96xf32, #tpu.memory_space<vmem>>, %arg4: memref<32x32xf32, #tpu.memory_space<vmem>>, %arg5: memref<32x64xf32, #tpu.memory_space<vmem>>, %arg6: memref<1x64xf32, #tpu.memory_space<vmem>>, %arg7: memref<64x32xf32, #tpu.memory_space<vmem>>, %arg8: memref<6x32xf32, #tpu.memory_space<vmem>>, %arg9: memref<16x32xf32, #tpu.memory_space<vmem>>) attributes {dimension_semantics = [#tpu.dimension_semantics<parallel>], iteration_bounds = array<i64: 1>, scalar_prefetch = 0 : i64, scratch_operands = 0 : i64, tpu.core_type = #tpu.core_type<tc>, window_params = [{transform_indices = @transform_0, window_bounds = array<i64: 16, 32>}, {pipeline_mode = #tpu.pipeline_mode<synchronous>, transform_indices = @transform_1, window_bounds = array<i64: 32, 96>}, {pipeline_mode = #tpu.pipeline_mode<synchronous>, transform_indices = @transform_2, window_bounds = array<i64: 1, 96>}, {pipeline_mode = #tpu.pipeline_mode<synchronous>, transform_indices = @transform_3, window_bounds = array<i64: 32, 32>}, {pipeline_mode = #tpu.pipeline_mode<synchronous>, transform_indices = @transform_4, window_bounds = array<i64: 32, 64>}, {pipeline_mode = #tpu.pipeline_mode<synchronous>, transform_indices = @transform_5, window_bounds = array<i64: 1, 64>}, {pipeline_mode = #tpu.pipeline_mode<synchronous>, transform_indices = @transform_6, window_bounds = array<i64: 64, 32>}, {pipeline_mode = #tpu.pipeline_mode<synchronous>, transform_indices = @transform_7, window_bounds = array<i64: 6, 32>}, {transform_indices = @transform_8, window_bounds = array<i64: 16, 32>}]} {
    %c0 = arith.constant 0 : index
    %c0_0 = arith.constant 0 : index
    %0 = vector.load %arg1[%c0, %c0_0] : memref<16x32xf32, #tpu.memory_space<vmem>>, vector<16x32xf32>
    %c0_1 = arith.constant 0 : index
    %c0_2 = arith.constant 0 : index
    %1 = vector.load %arg8[%c0_1, %c0_2] : memref<6x32xf32, #tpu.memory_space<vmem>>, vector<6x32xf32>
    %2 = vector.extract_strided_slice %1 {offsets = [0, 0], sizes = [1, 32], strides = [1, 1]} : vector<6x32xf32> to vector<1x32xf32>
    %3 = vector.extract_strided_slice %1 {offsets = [1, 0], sizes = [1, 32], strides = [1, 1]} : vector<6x32xf32> to vector<1x32xf32>
    %4 = vector.extract_strided_slice %1 {offsets = [2, 0], sizes = [1, 32], strides = [1, 1]} : vector<6x32xf32> to vector<1x32xf32>
    %5 = vector.extract_strided_slice %1 {offsets = [3, 0], sizes = [1, 32], strides = [1, 1]} : vector<6x32xf32> to vector<1x32xf32>
    %6 = vector.extract_strided_slice %1 {offsets = [4, 0], sizes = [1, 32], strides = [1, 1]} : vector<6x32xf32> to vector<1x32xf32>
    %7 = vector.extract_strided_slice %1 {offsets = [5, 0], sizes = [1, 32], strides = [1, 1]} : vector<6x32xf32> to vector<1x32xf32>
    %c0_3 = arith.constant 0 : index
    %c0_4 = arith.constant 0 : index
    %8 = vector.load %arg2[%c0_3, %c0_4] : memref<32x96xf32, #tpu.memory_space<vmem>>, vector<32x96xf32>
    %cst = arith.constant dense<0.000000e+00> : vector<16x96xf32>
    %9 = tpu.matmul %0, %8, %cst {dimension_numbers = #tpu.dot_dimension_numbers<[1], [0], [0], [1], [0, 0, 1, 1], [], []>} : vector<16x32xf32>, vector<32x96xf32>, vector<16x96xf32> -> vector<16x96xf32>
    %c0_5 = arith.constant 0 : index
    %c0_6 = arith.constant 0 : index
    %10 = vector.load %arg3[%c0_5, %c0_6] : memref<1x96xf32, #tpu.memory_space<vmem>>, vector<1x96xf32>
    %11 = vector.broadcast %10 : vector<1x96xf32> to vector<16x96xf32>
    %12 = arith.addf %9, %11 : vector<16x96xf32>
    %13 = vector.extract_strided_slice %12 {offsets = [0, 0], sizes = [16, 8], strides = [1, 1]} : vector<16x96xf32> to vector<16x8xf32>
    %14 = vector.shape_cast %13 : vector<16x8xf32> to vector<2x8x8xf32>
    %15 = vector.extract_strided_slice %12 {offsets = [0, 8], sizes = [16, 8], strides = [1, 1]} : vector<16x96xf32> to vector<16x8xf32>
    %16 = vector.shape_cast %15 : vector<16x8xf32> to vector<2x8x8xf32>
    %17 = vector.extract_strided_slice %12 {offsets = [0, 16], sizes = [16, 8], strides = [1, 1]} : vector<16x96xf32> to vector<16x8xf32>
    %18 = vector.shape_cast %17 : vector<16x8xf32> to vector<2x8x8xf32>
    %19 = vector.extract_strided_slice %12 {offsets = [0, 24], sizes = [16, 8], strides = [1, 1]} : vector<16x96xf32> to vector<16x8xf32>
    %20 = vector.shape_cast %19 : vector<16x8xf32> to vector<2x8x8xf32>
    %21 = tpu.concatenate %14, %16, %18, %20 in 0 : vector<2x8x8xf32>, vector<2x8x8xf32>, vector<2x8x8xf32>, vector<2x8x8xf32> -> vector<8x8x8xf32>
    %22 = vector.extract_strided_slice %12 {offsets = [0, 32], sizes = [16, 8], strides = [1, 1]} : vector<16x96xf32> to vector<16x8xf32>
    %23 = vector.shape_cast %22 : vector<16x8xf32> to vector<2x8x8xf32>
    %24 = vector.extract_strided_slice %12 {offsets = [0, 40], sizes = [16, 8], strides = [1, 1]} : vector<16x96xf32> to vector<16x8xf32>
    %25 = vector.shape_cast %24 : vector<16x8xf32> to vector<2x8x8xf32>
    %26 = vector.extract_strided_slice %12 {offsets = [0, 48], sizes = [16, 8], strides = [1, 1]} : vector<16x96xf32> to vector<16x8xf32>
    %27 = vector.shape_cast %26 : vector<16x8xf32> to vector<2x8x8xf32>
    %28 = vector.extract_strided_slice %12 {offsets = [0, 56], sizes = [16, 8], strides = [1, 1]} : vector<16x96xf32> to vector<16x8xf32>
    %29 = vector.shape_cast %28 : vector<16x8xf32> to vector<2x8x8xf32>
    %30 = tpu.concatenate %23, %25, %27, %29 in 0 : vector<2x8x8xf32>, vector<2x8x8xf32>, vector<2x8x8xf32>, vector<2x8x8xf32> -> vector<8x8x8xf32>
    %31 = vector.extract_strided_slice %12 {offsets = [0, 64], sizes = [16, 8], strides = [1, 1]} : vector<16x96xf32> to vector<16x8xf32>
    %32 = vector.shape_cast %31 : vector<16x8xf32> to vector<2x8x8xf32>
    %33 = vector.extract_strided_slice %12 {offsets = [0, 72], sizes = [16, 8], strides = [1, 1]} : vector<16x96xf32> to vector<16x8xf32>
    %34 = vector.shape_cast %33 : vector<16x8xf32> to vector<2x8x8xf32>
    %35 = vector.extract_strided_slice %12 {offsets = [0, 80], sizes = [16, 8], strides = [1, 1]} : vector<16x96xf32> to vector<16x8xf32>
    %36 = vector.shape_cast %35 : vector<16x8xf32> to vector<2x8x8xf32>
    %37 = vector.extract_strided_slice %12 {offsets = [0, 88], sizes = [16, 8], strides = [1, 1]} : vector<16x96xf32> to vector<16x8xf32>
    %38 = vector.shape_cast %37 : vector<16x8xf32> to vector<2x8x8xf32>
    %39 = tpu.concatenate %32, %34, %36, %38 in 0 : vector<2x8x8xf32>, vector<2x8x8xf32>, vector<2x8x8xf32>, vector<2x8x8xf32> -> vector<8x8x8xf32>
    "tpu.trace_start"() <{level = 10 : i32, message = "bqd,bkd->bqk"}> : () -> ()
    %cst_7 = arith.constant dense<0.000000e+00> : vector<8x8x8xf32>
    %40 = tpu.matmul %21, %30, %cst_7 {dimension_numbers = #tpu.dot_dimension_numbers<[2], [2], [1], [1], [0, 0, 0, 1, 1, 1], [0], [0]>} : vector<8x8x8xf32>, vector<8x8x8xf32>, vector<8x8x8xf32> -> vector<8x8x8xf32>
    "tpu.trace_stop"() : () -> ()
    %cst_8 = arith.constant dense<0xFF800000> : vector<8x8xf32>
    %41 = vector.multi_reduction <maximumf>, %40, %cst_8 [2] : vector<8x8x8xf32> to vector<8x8xf32>
    %42 = vector.shape_cast %41 : vector<8x8xf32> to vector<8x8x1xf32>
    %43 = vector.broadcast %42 : vector<8x8x1xf32> to vector<8x8x8xf32>
    %44 = arith.subf %40, %43 : vector<8x8x8xf32>
    %45 = math.exp %44 : vector<8x8x8xf32>
    %cst_9 = arith.constant dense<0.000000e+00> : vector<8x8xf32>
    %46 = vector.multi_reduction <add>, %45, %cst_9 [2] : vector<8x8x8xf32> to vector<8x8xf32>
    %47 = vector.shape_cast %46 : vector<8x8xf32> to vector<8x8x1xf32>
    %48 = tpu.reciprocal %47 {approx = true} : vector<8x8x1xf32> -> vector<8x8x1xf32>
    "tpu.trace_start"() <{level = 10 : i32, message = "bqk,bkd->bqd"}> : () -> ()
    %cst_10 = arith.constant dense<0.000000e+00> : vector<8x8x8xf32>
    %49 = tpu.matmul %45, %39, %cst_10 {dimension_numbers = #tpu.dot_dimension_numbers<[2], [1], [1], [2], [0, 0, 0, 1, 1, 2], [0], [0]>} : vector<8x8x8xf32>, vector<8x8x8xf32>, vector<8x8x8xf32> -> vector<8x8x8xf32>
    "tpu.trace_stop"() : () -> ()
    %50 = vector.broadcast %48 : vector<8x8x1xf32> to vector<8x8x8xf32>
    %51 = arith.mulf %49, %50 : vector<8x8x8xf32>
    %c0_11 = arith.constant 0 : index
    %c0_12 = arith.constant 0 : index
    %52 = vector.load %arg4[%c0_11, %c0_12] : memref<32x32xf32, #tpu.memory_space<vmem>>, vector<32x32xf32>
    %53 = vector.extract_strided_slice %51 {offsets = [0, 0, 0], sizes = [2, 8, 8], strides = [1, 1, 1]} : vector<8x8x8xf32> to vector<2x8x8xf32>
    %54 = vector.shape_cast %53 : vector<2x8x8xf32> to vector<16x8xf32>
    %55 = vector.extract_strided_slice %52 {offsets = [0, 0], sizes = [8, 32], strides = [1, 1]} : vector<32x32xf32> to vector<8x32xf32>
    %cst_13 = arith.constant dense<0.000000e+00> : vector<16x32xf32>
    %56 = tpu.matmul %54, %55, %cst_13 {dimension_numbers = #tpu.dot_dimension_numbers<[1], [0], [0], [1], [0, 0, 1, 1], [], []>} : vector<16x8xf32>, vector<8x32xf32>, vector<16x32xf32> -> vector<16x32xf32>
    %57 = vector.broadcast %2 : vector<1x32xf32> to vector<16x32xf32>
    %58 = arith.addf %57, %56 : vector<16x32xf32>
    %59 = vector.extract_strided_slice %51 {offsets = [2, 0, 0], sizes = [2, 8, 8], strides = [1, 1, 1]} : vector<8x8x8xf32> to vector<2x8x8xf32>
    %60 = vector.shape_cast %59 : vector<2x8x8xf32> to vector<16x8xf32>
    %61 = vector.extract_strided_slice %52 {offsets = [8, 0], sizes = [8, 32], strides = [1, 1]} : vector<32x32xf32> to vector<8x32xf32>
    %cst_14 = arith.constant dense<0.000000e+00> : vector<16x32xf32>
    %62 = tpu.matmul %60, %61, %cst_14 {dimension_numbers = #tpu.dot_dimension_numbers<[1], [0], [0], [1], [0, 0, 1, 1], [], []>} : vector<16x8xf32>, vector<8x32xf32>, vector<16x32xf32> -> vector<16x32xf32>
    %63 = arith.addf %58, %62 : vector<16x32xf32>
    %64 = vector.extract_strided_slice %51 {offsets = [4, 0, 0], sizes = [2, 8, 8], strides = [1, 1, 1]} : vector<8x8x8xf32> to vector<2x8x8xf32>
    %65 = vector.shape_cast %64 : vector<2x8x8xf32> to vector<16x8xf32>
    %66 = vector.extract_strided_slice %52 {offsets = [16, 0], sizes = [8, 32], strides = [1, 1]} : vector<32x32xf32> to vector<8x32xf32>
    %cst_15 = arith.constant dense<0.000000e+00> : vector<16x32xf32>
    %67 = tpu.matmul %65, %66, %cst_15 {dimension_numbers = #tpu.dot_dimension_numbers<[1], [0], [0], [1], [0, 0, 1, 1], [], []>} : vector<16x8xf32>, vector<8x32xf32>, vector<16x32xf32> -> vector<16x32xf32>
    %68 = arith.addf %63, %67 : vector<16x32xf32>
    %69 = vector.extract_strided_slice %51 {offsets = [6, 0, 0], sizes = [2, 8, 8], strides = [1, 1, 1]} : vector<8x8x8xf32> to vector<2x8x8xf32>
    %70 = vector.shape_cast %69 : vector<2x8x8xf32> to vector<16x8xf32>
    %71 = vector.extract_strided_slice %52 {offsets = [24, 0], sizes = [8, 32], strides = [1, 1]} : vector<32x32xf32> to vector<8x32xf32>
    %cst_16 = arith.constant dense<0.000000e+00> : vector<16x32xf32>
    %72 = tpu.matmul %70, %71, %cst_16 {dimension_numbers = #tpu.dot_dimension_numbers<[1], [0], [0], [1], [0, 0, 1, 1], [], []>} : vector<16x8xf32>, vector<8x32xf32>, vector<16x32xf32> -> vector<16x32xf32>
    %73 = arith.addf %68, %72 : vector<16x32xf32>
    %74 = arith.addf %0, %73 : vector<16x32xf32>
    %cst_17 = arith.constant dense<0.000000e+00> : vector<16xf32>
    %75 = vector.multi_reduction <add>, %74, %cst_17 [1] : vector<16x32xf32> to vector<16xf32>
    %76 = vector.shape_cast %75 : vector<16xf32> to vector<16x1xf32>
    %cst_18 = arith.constant 3.200000e+01 : f32
    %77 = vector.broadcast %cst_18 : f32 to vector<16x1xf32>
    %78 = arith.divf %76, %77 : vector<16x1xf32>
    %79 = vector.broadcast %78 : vector<16x1xf32> to vector<16x32xf32>
    %80 = arith.subf %74, %79 : vector<16x32xf32>
    %81 = arith.mulf %80, %80 : vector<16x32xf32>
    %cst_19 = arith.constant dense<0.000000e+00> : vector<16xf32>
    %82 = vector.multi_reduction <add>, %81, %cst_19 [1] : vector<16x32xf32> to vector<16xf32>
    %83 = vector.shape_cast %82 : vector<16xf32> to vector<16x1xf32>
    %cst_20 = arith.constant 3.200000e+01 : f32
    %84 = vector.broadcast %cst_20 : f32 to vector<16x1xf32>
    %85 = arith.divf %83, %84 : vector<16x1xf32>
    %cst_21 = arith.constant 9.99999974E-6 : f32
    %86 = vector.broadcast %cst_21 : f32 to vector<16x1xf32>
    %87 = arith.addf %85, %86 : vector<16x1xf32>
    %88 = math.rsqrt %87 : vector<16x1xf32>
    %89 = vector.broadcast %78 : vector<16x1xf32> to vector<16x32xf32>
    %90 = arith.subf %74, %89 : vector<16x32xf32>
    %91 = vector.broadcast %88 : vector<16x1xf32> to vector<16x32xf32>
    %92 = arith.mulf %90, %91 : vector<16x32xf32>
    %93 = vector.broadcast %3 : vector<1x32xf32> to vector<16x32xf32>
    %94 = arith.mulf %92, %93 : vector<16x32xf32>
    %95 = vector.broadcast %4 : vector<1x32xf32> to vector<16x32xf32>
    %96 = arith.addf %94, %95 : vector<16x32xf32>
    %c0_22 = arith.constant 0 : index
    %c0_23 = arith.constant 0 : index
    %97 = vector.load %arg5[%c0_22, %c0_23] : memref<32x64xf32, #tpu.memory_space<vmem>>, vector<32x64xf32>
    %cst_24 = arith.constant dense<0.000000e+00> : vector<16x64xf32>
    %98 = tpu.matmul %96, %97, %cst_24 {dimension_numbers = #tpu.dot_dimension_numbers<[1], [0], [0], [1], [0, 0, 1, 1], [], []>} : vector<16x32xf32>, vector<32x64xf32>, vector<16x64xf32> -> vector<16x64xf32>
    %c0_25 = arith.constant 0 : index
    %c0_26 = arith.constant 0 : index
    %99 = vector.load %arg6[%c0_25, %c0_26] : memref<1x64xf32, #tpu.memory_space<vmem>>, vector<1x64xf32>
    %100 = vector.broadcast %99 : vector<1x64xf32> to vector<16x64xf32>
    %101 = arith.addf %98, %100 : vector<16x64xf32>
    %cst_27 = arith.constant 0.000000e+00 : f32
    %102 = vector.broadcast %cst_27 : f32 to vector<16x64xf32>
    %103 = arith.maximumf %101, %102 : vector<16x64xf32>
    %c0_28 = arith.constant 0 : index
    %c0_29 = arith.constant 0 : index
    %104 = vector.load %arg7[%c0_28, %c0_29] : memref<64x32xf32, #tpu.memory_space<vmem>>, vector<64x32xf32>
    %cst_30 = arith.constant dense<0.000000e+00> : vector<16x32xf32>
    %105 = tpu.matmul %103, %104, %cst_30 {dimension_numbers = #tpu.dot_dimension_numbers<[1], [0], [0], [1], [0, 0, 1, 1], [], []>} : vector<16x64xf32>, vector<64x32xf32>, vector<16x32xf32> -> vector<16x32xf32>
    %106 = vector.broadcast %5 : vector<1x32xf32> to vector<16x32xf32>
    %107 = arith.addf %105, %106 : vector<16x32xf32>
    %108 = arith.addf %96, %107 : vector<16x32xf32>
    %cst_31 = arith.constant dense<0.000000e+00> : vector<16xf32>
    %109 = vector.multi_reduction <add>, %108, %cst_31 [1] : vector<16x32xf32> to vector<16xf32>
    %110 = vector.shape_cast %109 : vector<16xf32> to vector<16x1xf32>
    %cst_32 = arith.constant 3.200000e+01 : f32
    %111 = vector.broadcast %cst_32 : f32 to vector<16x1xf32>
    %112 = arith.divf %110, %111 : vector<16x1xf32>
    %113 = vector.broadcast %112 : vector<16x1xf32> to vector<16x32xf32>
    %114 = arith.subf %108, %113 : vector<16x32xf32>
    %115 = arith.mulf %114, %114 : vector<16x32xf32>
    %cst_33 = arith.constant dense<0.000000e+00> : vector<16xf32>
    %116 = vector.multi_reduction <add>, %115, %cst_33 [1] : vector<16x32xf32> to vector<16xf32>
    %117 = vector.shape_cast %116 : vector<16xf32> to vector<16x1xf32>
    %cst_34 = arith.constant 3.200000e+01 : f32
    %118 = vector.broadcast %cst_34 : f32 to vector<16x1xf32>
    %119 = arith.divf %117, %118 : vector<16x1xf32>
    %cst_35 = arith.constant 9.99999974E-6 : f32
    %120 = vector.broadcast %cst_35 : f32 to vector<16x1xf32>
    %121 = arith.addf %119, %120 : vector<16x1xf32>
    %122 = math.rsqrt %121 : vector<16x1xf32>
    %123 = vector.broadcast %112 : vector<16x1xf32> to vector<16x32xf32>
    %124 = arith.subf %108, %123 : vector<16x32xf32>
    %125 = vector.broadcast %122 : vector<16x1xf32> to vector<16x32xf32>
    %126 = arith.mulf %124, %125 : vector<16x32xf32>
    %127 = vector.broadcast %6 : vector<1x32xf32> to vector<16x32xf32>
    %128 = arith.mulf %126, %127 : vector<16x32xf32>
    %129 = vector.broadcast %7 : vector<1x32xf32> to vector<16x32xf32>
    %130 = arith.addf %128, %129 : vector<16x32xf32>
    %c0_36 = arith.constant 0 : index
    %c0_37 = arith.constant 0 : index
    %131 = vector.load %arg9[%c0_36, %c0_37] : memref<16x32xf32, #tpu.memory_space<vmem>>, vector<16x32xf32>
    tpu.vector_store %arg9[%c0_36, %c0_37], %130 {strides = array<i32>} : memref<16x32xf32, #tpu.memory_space<vmem>>, vector<16x32xf32>,
    return
  }
  func.func @transform_0(%arg0: i32) -> (i32, i32) {
    %c0_i32 = arith.constant 0 : i32
    %c0_i32_0 = arith.constant 0 : i32
    return %arg0, %c0_i32 : i32, i32
  }
  func.func @transform_1(%arg0: i32) -> (i32, i32) {
    %c0_i32 = arith.constant 0 : i32
    %c0_i32_0 = arith.constant 0 : i32
    %c0_i32_1 = arith.constant 0 : i32
    return %c0_i32, %c0_i32_0 : i32, i32
  }
  func.func @transform_2(%arg0: i32) -> (i32, i32) {
    %c0_i32 = arith.constant 0 : i32
    %c0_i32_0 = arith.constant 0 : i32
    %c0_i32_1 = arith.constant 0 : i32
    return %c0_i32, %c0_i32_0 : i32, i32
  }
  func.func @transform_3(%arg0: i32) -> (i32, i32) {
    %c0_i32 = arith.constant 0 : i32
    %c0_i32_0 = arith.constant 0 : i32
    %c0_i32_1 = arith.constant 0 : i32
    return %c0_i32, %c0_i32_0 : i32, i32
  }
  func.func @transform_4(%arg0: i32) -> (i32, i32) {
    %c0_i32 = arith.constant 0 : i32
    %c0_i32_0 = arith.constant 0 : i32
    %c0_i32_1 = arith.constant 0 : i32
    return %c0_i32, %c0_i32_0 : i32, i32
  }
  func.func @transform_5(%arg0: i32) -> (i32, i32) {
    %c0_i32 = arith.constant 0 : i32
    %c0_i32_0 = arith.constant 0 : i32
    %c0_i32_1 = arith.constant 0 : i32
    return %c0_i32, %c0_i32_0 : i32, i32
  }
  func.func @transform_6(%arg0: i32) -> (i32, i32) {
    %c0_i32 = arith.constant 0 : i32
    %c0_i32_0 = arith.constant 0 : i32
    %c0_i32_1 = arith.constant 0 : i32
    return %c0_i32, %c0_i32_0 : i32, i32
  }
  func.func @transform_7(%arg0: i32) -> (i32, i32) {
    %c0_i32 = arith.constant 0 : i32
    %c0_i32_0 = arith.constant 0 : i32
    %c0_i32_1 = arith.constant 0 : i32
    return %c0_i32, %c0_i32_0 : i32, i32
  }
  func.func @transform_8(%arg0: i32) -> (i32, i32) {
    %c0_i32 = arith.constant 0 : i32
    %c0_i32_0 = arith.constant 0 : i32
    return %arg0, %c0_i32 : i32, i32
  }
}

</mosaic_0001>

<bundles_post_ra>
// kernel: tpu_custom_call.1
= control target key start
LH: loop header
LB: loop body
LE: loop exit
PB: predicated region body
PF: predicated region fallthrough
CT: control target
= control target key end

     0   :  { %13 = vsyncpa [#allocation3], 0  ;;  %s2802_s0 = inlined_call_operand.hbm [shape: f32[16,32], index: 0, kind: input, shape index: {}]   ;;  %s2803_s1 = inlined_call_operand.vmem [shape: f32[32,96], index: 1, kind: input, shape index: {}]   ;;  %s2804_s2 = inlined_call_operand.vmem [shape: f32[1,96], index: 2, kind: input, shape index: {}]   ;;  %s2805_s3 = inlined_call_operand.vmem [shape: f32[32,32], index: 3, kind: input, shape index: {}]   ;;  %s2806_s4 = inlined_call_operand.vmem [shape: f32[32,64], index: 4, kind: input, shape index: {}]   ;;  %s2807_s5 = inlined_call_operand.vmem [shape: f32[1,64], index: 5, kind: input, shape index: {}]   ;;  %s2808_s6 = inlined_call_operand.vmem [shape: f32[64,32], index: 6, kind: input, shape index: {}]   ;;  %s2809_s7 = inlined_call_operand.vmem [shape: f32[6,32], index: 7, kind: input, shape index: {}]   ;;  %s2810_s8 = inlined_call_operand.hbm [shape: f32[16,32], index: 8, kind: output, shape index: {}]  }
   0x1   :  { %14 = vsyncpa [#allocation4], 0  ;;  %s2473_s27 = smov [#allocation2]   ;;  %s2425_s9 = scalar_lea.hbm %s2802_s0, 256 }
   0x2   :  { %s20_s28 = sshll.u32 %s2473_s27, 4  ;;  %p2426_p0 = scmp.ne.s32.totalorder %s2802_s0, %s2425_s9  ;;  %s21_s28 = int_to_ptr.vmem [resolvable:$true] %s20_s28 }
   0x3   :  { %p2429_p1 = scmp.lt.u32.totalorder %s2425_s9, %s2802_s0 }
   0x5   :  { %p2431_p2 = pnand %p2429_p1, %p2426_p0 }
   0x7   :  { %2434 = shalt.err (!%p2431_p2)
}
   0x8   :  { %s2435_s14 = scalar_lea.vmem %s21_s28, 256  ;;  %p2440_p4 = scmp.lt.s32.totalorder %s21_s28, %s21_s28 }
   0x9   :  { %p2436_p3 = scmp.ne.s32.totalorder %s21_s28, %s2435_s14  ;;  %p2441_p5 = scmp.lt.s32.totalorder %s2435_s14, %s2435_s14 }
   0xb   :  { %p2442_p6 = por %p2441_p5, %p2440_p4 }
   0xd   :  { %p2443_p7 = pnand %p2442_p6, %p2436_p3 }
   0xf   :  { %2446 = shalt.err (!%p2443_p7)
}
  0x10   :  { %s2474_s15 = smov 128   ;;  %s2475_s16 = smov 8  }
  0x11   :  { %26 = dma.hbm_to_vmem [thread:$0]  %s2802_s0, 256, %s21_s28, [#allocation3], %s2474_s15, %s2474_s15, %s2475_s16  }
  0x12   :  { %2469 = dma.done.wait [#allocation3], 256  }
  0x13   :  { %2470 = vsyncadd [#allocation3], 4294967040  ;;  %vm58_vm0 = vcmask 261120   ;;  %v47_v0 = vld [vmem:[%s2803_s1] sm:$0xff]  ;;  %v48_v1 = vld [vmem:[%s2803_s1 + $0x8] sm:$0xff]  ;;  %v2476_v10 = vmov 0.0  }
  0x14   :  { %v49_v2 = vld [vmem:[%s2803_s1 + $0x10] sm:$0xff]  ;;  %v2334_v3 = vpack.c.bf16 %v48_v1, %v47_v0  ;;  %v50_v4 = vld [vmem:[%s2803_s1 + $0x18] sm:$0xff]  ;;  %v2556_v5 = vld [vmem:[#allocation2] sm:$0xff]  ;;  %2209 = vmatprep.subr.mxu1 %v2476_v10  ;;  %s2477_s1 = smov 112   ;;  %s2478_s28 = smov 120   ;;  %vm2479_vm1 = vmmov 0  }
  0x15   :  { %v2338_v6 = vpack.c.bf16 %v50_v4, %v49_v2  ;;  %2201 = vmatprep.mubr.msk.f32.mxu0 %vm58_vm0, %v2556_v5  ;;  %v2560_v7 = vld [vmem:[#allocation2 + $0x8] sm:$0xff]  ;;  %v2087_v8 = vld [vmem:[%s2804_s2] ss:$0 sm:$0xff]  ;;  %2211 = vmatprep.mubr.msk.f32.mxu1 %vm2479_vm1, %v2476_v10  ;;  %s2480_s2 = smov 104   ;;  %s2481_s29 = smov 96   ;;  %vm156_vm2 = vcmask 64512  }
  0x16   :  { %2335 = vmatprep.subr.bf16.mxu0 %v2334_v3  ;;  %s2482_s30 = smov 64   ;;  %vm1946_vm3 = vcmask 523264  }
  0x17   :  { %2337 = vmatpush3.bf16.msra.mxu0 %v2334_v3 }
  0x18   :  { %2339 = vmatprep.subr.bf16.mxu0 %v2338_v6 }
  0x1b   :  { %2341 = vmatpush3.bf16.msra.mxu0 %v2338_v6 }
  0x1c   :  { %2204 = vmatprep.subr.mxu0 %v2476_v10 }
  0x1e   :  { %2202 = vmatmul.mubr.msk.f32.vlgmr.msra.gmra.mrb[0].mxu0 %vm58_vm0, %v2560_v7 }
  0x1f   :  { %2206 = vmatprep.mubr.msk.f32.mxu0 %vm2479_vm1, %v2476_v10 }
  0xf1   :  { %v2203_v9 = vpop.f32.mrb[0].mxu0 }
  0xf2   :  { %v131_v11 = vpop.f32.mrb[1].mxu0  ;;  %v137_v13 = vadd.f32 %v2203_v9, %v2087_v8 }
  0xf3   :  { %v132_v12 = vadd.f32 %v2087_v8, %v131_v11 }
  0xf5   :  { %146 = vrot.lane.b32.xlu1 %v132_v12, %s2477_s1  ;;  %142 = vrot.lane.b32.xlu0 %v132_v12, %s2478_s28 }
  0xf9   :  { %148 = vrot.lane.b32.xlu1 %v137_v13, %s2477_s1  ;;  %144 = vrot.lane.b32.xlu0 %v137_v13, %s2478_s28 }
  0xfd   :  { %152 = vrot.lane.b32.xlu1 %v137_v13, %s2480_s2  ;;  %150 = vrot.lane.b32.xlu0 %v132_v12, %s2480_s2 }
 0x101   :  { %231 = vrot.lane.b32.xlu1 %v137_v13, %s2481_s29  ;;  %154 = vrot.lane.b32.xlu0 %v132_v12, %s2481_s29 }
 0x167   :  { %v2573_v14 = vpop.permute.xlu1 %146  ;;  %v143_v15 = vpop.permute.xlu0 %142 }
 0x168   :  { %307 = vrot.lane.b32.xlu0 %v143_v15, %s2481_s29 }
 0x16b   :  { %v2575_v16 = vpop.permute.xlu1 %148  ;;  %v145_v17 = vpop.permute.xlu0 %144 }
 0x16c   :  { %459 = vrot.lane.b32.xlu0 %v2573_v14, %s2481_s29  ;;  %383 = vrot.lane.b32.xlu1 %v145_v17, %s2481_s29 }
 0x16f   :  { %v2578_v18 = vpop.permute.xlu1 %152  ;;  %v2580_v19 = vpop.permute.xlu0 %150 }
 0x170   :  { %535 = vrot.lane.b32.xlu1 %v2575_v16, %s2481_s29  ;;  %611 = vrot.lane.b32.xlu0 %v2580_v19, %s2481_s29 }
 0x173   :  { %v232_v20 = vpop.permute.xlu1 %231  ;;  %v155_v21 = vpop.permute.xlu0 %154 }
 0x174   :  { %2210 = vmatpush3.xpose.msk.msra.mxu1 %vm156_vm2, %v232_v20  ;;  %687 = vrot.lane.b32.xlu1 %v2578_v18, %s2481_s29 }
 0x175   :  { %919 = vrot.lane.b32.xlu0 %v137_v13, %s2482_s30  ;;  %2205 = vmatpush3.xpose.msk.msra.mxu0 %vm156_vm2, %v155_v21 }
 0x176   :  { %2214 = vmatprep.subr.mxu0 %v2476_v10  ;;  %2219 = vmatprep.subr.mxu1 %v2476_v10 }
 0x177   :  { %2212 = vmatmul.mubr.msk.f32.vlgmr.msra.gmra.mrb[0].mxu1 %vm156_vm2, %v137_v13 }
 0x178   :  { %2207 = vmatmul.mubr.msk.f32.vlgmr.msra.gmra.mrb[2].mxu0 %vm156_vm2, %v132_v12  ;;  %843 = vrot.lane.b32.xlu1 %v132_v12, %s2482_s30 }
 0x179   :  { %2216 = vmatprep.mubr.msk.f32.mxu0 %vm2479_vm1, %v2476_v10  ;;  %2221 = vmatprep.mubr.msk.f32.mxu1 %vm2479_vm1, %v2476_v10 }
 0x17c   :  { %1071 = vrot.lane.b32.xlu1 %v145_v17, %s2482_s30 }
 0x180   :  { %995 = vrot.lane.b32.xlu1 %v143_v15, %s2482_s30 }
 0x1da   :  { %v308_v22 = vpop.permute.xlu0 %307 }
 0x1db   :  { %2215 = vmatpush3.xpose.msk.msra.mxu0 %vm156_vm2, %v308_v22 }
 0x1dc   :  { %2224 = vmatprep.subr.mxu0 %v2476_v10 }
 0x1de   :  { %v384_v23 = vpop.permute.xlu1 %383  ;;  %2217 = vmatmul.mubr.msk.f32.vlgmr.msra.gmra.mrb[4].mxu0 %vm156_vm2, %v143_v15  ;;  %v460_v24 = vpop.permute.xlu0 %459 }
 0x1df   :  { %2220 = vmatpush3.xpose.msk.msra.mxu1 %vm156_vm2, %v384_v23  ;;  %2225 = vmatpush3.xpose.msk.msra.mxu0 %vm156_vm2, %v460_v24 }
 0x1e0   :  { %2226 = vmatprep.mubr.msk.f32.mxu0 %vm2479_vm1, %v2476_v10  ;;  %2229 = vmatprep.subr.mxu1 %v2476_v10 }
 0x1e1   :  { %2234 = vmatprep.subr.mxu0 %v2476_v10 }
 0x1e2   :  { %2222 = vmatmul.mubr.msk.f32.vlgmr.msra.gmra.mrb[2].mxu1 %vm156_vm2, %v145_v17  ;;  %v536_v25 = vpop.permute.xlu1 %535  ;;  %2227 = vmatmul.mubr.msk.f32.vlgmr.msra.gmra.mrb[6].mxu0 %vm156_vm2, %v2573_v14  ;;  %v612_v26 = vpop.permute.xlu0 %611 }
 0x1e3   :  { %2230 = vmatpush3.xpose.msk.msra.mxu1 %vm156_vm2, %v536_v25  ;;  %2235 = vmatpush3.xpose.msk.msra.mxu0 %vm156_vm2, %v612_v26 }
 0x1e4   :  { %2231 = vmatprep.mubr.msk.f32.mxu1 %vm2479_vm1, %v2476_v10  ;;  %2236 = vmatprep.mubr.msk.f32.mxu0 %vm2479_vm1, %v2476_v10 }
 0x1e5   :  { %2239 = vmatprep.subr.mxu1 %v2476_v10  ;;  %2244 = vmatprep.subr.mxu0 %v2476_v10 }
 0x1e6   :  { %2232 = vmatmul.mubr.msk.f32.vlgmr.msra.gmra.mrb[4].mxu1 %vm156_vm2, %v2575_v16  ;;  %v688_v27 = vpop.permute.xlu1 %687  ;;  %2237 = vmatmul.mubr.msk.f32.vlgmr.msra.gmra.mrb[8].mxu0 %vm156_vm2, %v2580_v19 }
 0x1e7   :  { %2240 = vmatpush3.xpose.msk.msra.mxu1 %vm156_vm2, %v688_v27  ;;  %2241 = vmatprep.mubr.msk.f32.mxu1 %vm2479_vm1, %v2476_v10  ;;  %v920_v28 = vpop.permute.xlu0 %919 }
 0x1e8   :  { %2249 = vmatprep.subr.mxu1 %v2476_v10  ;;  %2246 = vmatprep.mubr.msk.f32.mxu0 %vm2479_vm1, %v2476_v10 }
 0x1ea   :  { %2242 = vmatmul.mubr.msk.f32.vlgmr.msra.gmra.mrb[6].mxu1 %vm156_vm2, %v2578_v18  ;;  %v844_v29 = vpop.permute.xlu1 %843 }
 0x1eb   :  { %2245 = vmatpush3.msra.mxu0 %v844_v29  ;;  %2250 = vmatpush3.msra.mxu1 %v920_v28 }
 0x1ec   :  { %2251 = vmatprep.mubr.msk.f32.mxu1 %vm2479_vm1, %v2476_v10  ;;  %2254 = vmatprep.subr.mxu0 %v2476_v10 }
 0x1ed   :  { %2259 = vmatprep.subr.mxu1 %v2476_v10 }
 0x1ee   :  { %v1072_v52 = vpop.permute.xlu1 %1071 }
 0x1f2   :  { %v996_v53 = vpop.permute.xlu1 %995 }
 0x24a   :  { %v303_v30 = vpop.f32.mrb[0].mxu1 }
 0x24b   :  { %v227_v31 = vpop.f32.mrb[2].mxu0  ;;  %v2213_v32 = vpop.f32.mrb[1].mxu1  ;;  %v766_v33 = vsel %vm156_vm2, %v303_v30, -inf }
 0x24c   :  { %v2208_v34 = vpop.f32.mrb[3].mxu0  ;;  %767 = vmax.xlane.f32.xlu1 %v766_v33  ;;  %v763_v35 = vsel %vm156_vm2, %v227_v31, -inf  ;;  %v1459_v33 = vld [vmem:[%s2805_s3] sm:$0xff] }
 0x24d   :  { %764 = vmax.xlane.f32.xlu0 %v763_v35 }
 0x25d   :  { %1223 = vrot.lane.b32.xlu1 %v2575_v16, %s2482_s30 }
 0x2b1   :  { %v2639_v36 = vpop.f32.mrb[4].mxu0 }
 0x2b2   :  { %v2218_v37 = vpop.f32.mrb[5].mxu0  ;;  %v769_v48 = vsel %vm156_vm2, %v2639_v36, -inf }
 0x2b5   :  { %v455_v38 = vpop.f32.mrb[2].mxu1  ;;  %v531_v39 = vpop.f32.mrb[6].mxu0 }
 0x2b6   :  { %v2223_v40 = vpop.f32.mrb[3].mxu1  ;;  %v2228_v41 = vpop.f32.mrb[7].mxu0  ;;  %v772_v42 = vsel %vm156_vm2, %v455_v38, -inf  ;;  %v775_v43 = vsel %vm156_vm2, %v531_v39, -inf }
 0x2b7   :  { %773 = vmax.xlane.f32.xlu0 %v772_v42  ;;  %776 = vmax.xlane.f32.xlu1 %v775_v43  ;;  %v1460_v40 = vld [vmem:[%s2805_s3 + $0x8] sm:$0xff] }
 0x2b9   :  { %v2643_v44 = vpop.f32.mrb[4].mxu1  ;;  %v683_v45 = vpop.f32.mrb[8].mxu0 }
 0x2ba   :  { %v2233_v46 = vpop.f32.mrb[5].mxu1  ;;  %v2238_v47 = vpop.f32.mrb[9].mxu0  ;;  %v781_v49 = vsel %vm156_vm2, %v683_v45, -inf  ;;  %v778_v62 = vsel %vm156_vm2, %v2643_v44, -inf }
 0x2bb   :  { %770 = vmax.xlane.f32.xlu0 %v769_v48  ;;  %782 = vmax.xlane.f32.xlu1 %v781_v49 }
 0x2bd   :  { %v2648_v50 = vpop.f32.mrb[6].mxu1 }
 0x2be   :  { %v2243_v51 = vpop.f32.mrb[7].mxu1  ;;  %v784_v0 = vsel %vm156_vm2, %v2648_v50, -inf }
 0x2cc   :  { %1375 = vrot.lane.b32.xlu1 %v2578_v18, %s2482_s30 }
 0x2d1   :  { %1147 = vrot.lane.b32.xlu0 %v2573_v14, %s2482_s30 }
 0x2d9   :  { %v768_v54 = vpop.xlane.xlu1 %767 }
 0x2da   :  { %v788_v55 = vsub.f32 %v303_v30, %v768_v54  ;;  %v765_v56 = vpop.xlane.xlu0 %764 }
 0x2db   :  { %v787_v57 = vsub.f32 %v227_v31, %v765_v56 }
 0x2dc   :  { %v797_v58 = vmul.f32 1.442695, %v788_v55 }
 0x2dd   :  { %v795_v59 = vmul.f32 1.442695, %v787_v57  ;;  %v1224_v2 = vpop.permute.xlu1 %1223 }
 0x2de   :  { %2385 = vpow2.f32 %v797_v58 }
 0x2df   :  { %2387 = vpow2.f32 %v795_v59 }
 0x2e8   :  { %v2386_v60 = vpop.eup %2385 }
 0x2e9   :  { %v2388_v61 = vpop.eup %2387  ;;  %2252 = vmatmul.mubr.msk.f32.vlgmr.msra.gmra.mrb[8].mxu1 %vm156_vm2, %v2386_v60  ;;  %v814_v63 = vsel %vm156_vm2, %v2386_v60, 0.0 }
 0x2ea   :  { %2247 = vmatmul.mubr.msk.f32.vlgmr.msra.gmra.mrb[10].mxu0 %vm156_vm2, %v2388_v61  ;;  %2260 = vmatpush3.msra.mxu1 %v1072_v52  ;;  %v811_v1 = vsel %vm156_vm2, %v2388_v61, 0.0 }
 0x2eb   :  { %2255 = vmatpush3.msra.mxu0 %v996_v53  ;;  %2261 = vmatprep.mubr.msk.f32.mxu1 %vm2479_vm1, %v2476_v10 }
 0x2ec   :  { %2269 = vmatprep.subr.mxu1 %v2476_v10  ;;  %2256 = vmatprep.mubr.msk.f32.mxu0 %vm2479_vm1, %v2476_v10 }
 0x2ed   :  { %2264 = vmatprep.subr.mxu0 %v2476_v10 }
 0x2f0   :  { %779 = vmax.xlane.f32.xlu0 %v778_v62  ;;  %815 = vadd.xlane.f32.xlu1 %v814_v63  ;;  %v1462_v62 = vld [vmem:[%s2805_s3 + $0x18] sm:$0xff] }
 0x2f4   :  { %785 = vmax.xlane.f32.xlu0 %v784_v0 }
 0x30a   :  { %1299 = vrot.lane.b32.xlu0 %v2580_v19, %s2482_s30 }
 0x329   :  { %812 = vadd.xlane.f32.xlu0 %v811_v1 }
 0x344   :  { %v777_v3 = vpop.xlane.xlu1 %776  ;;  %v774_v4 = vpop.xlane.xlu0 %773 }
 0x345   :  { %v791_v6 = vsub.f32 %v531_v39, %v777_v3  ;;  %v790_v8 = vsub.f32 %v455_v38, %v774_v4 }
 0x347   :  { %v803_v9 = vmul.f32 1.442695, %v791_v6  ;;  %v801_v11 = vmul.f32 1.442695, %v790_v8 }
 0x348   :  { %v783_v12 = vpop.xlane.xlu1 %782  ;;  %v771_v13 = vpop.xlane.xlu0 %770 }
 0x349   :  { %2389 = vpow2.f32 %v803_v9  ;;  %v793_v14 = vsub.f32 %v683_v45, %v783_v12  ;;  %v789_v15 = vsub.f32 %v2639_v36, %v771_v13 }
 0x34a   :  { %2391 = vpow2.f32 %v801_v11 }
 0x34b   :  { %v807_v16 = vmul.f32 1.442695, %v793_v14  ;;  %v799_v17 = vmul.f32 1.442695, %v789_v15 }
 0x34c   :  { %v1148_v24 = vpop.permute.xlu0 %1147  ;;  %v1376_v36 = vpop.permute.xlu1 %1375 }
 0x34d   :  { %2393 = vpow2.f32 %v807_v16 }
 0x34e   :  { %2395 = vpow2.f32 %v799_v17 }
 0x353   :  { %v2390_v18 = vpop.eup %2389 }
 0x354   :  { %v2392_v19 = vpop.eup %2391  ;;  %v823_v20 = vsel %vm156_vm2, %v2390_v18, 0.0 }
 0x355   :  { %2262 = vmatmul.mubr.msk.f32.vlgmr.msra.gmra.mrb[10].mxu1 %vm156_vm2, %v2392_v19  ;;  %824 = vadd.xlane.f32.xlu1 %v823_v20  ;;  %v820_v26 = vsel %vm156_vm2, %v2392_v19, 0.0 }
 0x356   :  { %2270 = vmatpush3.msra.mxu1 %v1224_v2  ;;  %2271 = vmatprep.mubr.msk.f32.mxu1 %vm2479_vm1, %v2476_v10 }
 0x357   :  { %v2394_v21 = vpop.eup %2393  ;;  %2279 = vmatprep.subr.mxu1 %v2476_v10 }
 0x358   :  { %v2396_v22 = vpop.eup %2395  ;;  %v829_v23 = vsel %vm156_vm2, %v2394_v21, 0.0 }
 0x359   :  { %2257 = vmatmul.mubr.msk.f32.vlgmr.msra.gmra.mrb[12].mxu0 %vm156_vm2, %v2396_v22  ;;  %830 = vadd.xlane.f32.xlu1 %v829_v23  ;;  %v817_v25 = vsel %vm156_vm2, %v2396_v22, 0.0 }
 0x35a   :  { %2265 = vmatpush3.msra.mxu0 %v1148_v24  ;;  %818 = vadd.xlane.f32.xlu0 %v817_v25  ;;  %v2721_v24 = vld [vmem:[%s2809_s7] sm:$0x3f] }
 0x35b   :  { %2266 = vmatprep.mubr.msk.f32.mxu0 %vm2479_vm1, %v2476_v10  ;;  %2274 = vmatprep.subr.mxu0 %v2476_v10 }
 0x35d   :  { %2267 = vmatmul.mubr.msk.f32.vlgmr.msra.gmra.mrb[14].mxu0 %vm156_vm2, %v2390_v18 }
 0x35e   :  { %821 = vadd.xlane.f32.xlu0 %v820_v26  ;;  %2276 = vmatprep.mubr.msk.f32.mxu0 %vm2479_vm1, %v2476_v10 }
 0x37d   :  { %v780_v27 = vpop.xlane.xlu0 %779  ;;  %v816_v41 = vpop.xlane.xlu1 %815 }
 0x37e   :  { %v792_v28 = vsub.f32 %v2643_v44, %v780_v27 }
 0x380   :  { %v805_v29 = vmul.f32 1.442695, %v792_v28 }
 0x381   :  { %v786_v30 = vpop.xlane.xlu0 %785 }
 0x382   :  { %2397 = vpow2.f32 %v805_v29  ;;  %v794_v31 = vsub.f32 %v2648_v50, %v786_v30  ;;  %v1461_v50 = vld [vmem:[%s2805_s3 + $0x10] sm:$0xff] }
 0x384   :  { %v809_v32 = vmul.f32 1.442695, %v794_v31 }
 0x385   :  { %v1300_v34 = vpop.permute.xlu0 %1299 }
 0x386   :  { %2399 = vpow2.f32 %v809_v32  ;;  %2275 = vmatpush3.msra.mxu0 %v1300_v34 }
 0x387   :  { %2277 = vmatmul.mubr.msk.f32.vlgmr.msra.gmra.mrb[16].mxu0 %vm156_vm2, %v2394_v21  ;;  %2284 = vmatprep.subr.mxu0 %v1459_v33  ;;  %v1544_v21 = vlaneseq }
 0x388   :  { %2285 = vmatpush3.msra.mxu0 %v1459_v33 }
 0x389   :  { %2289 = vmatprep.subr.mxu0 %v1460_v40  ;;  %v2715_v22 = vshrl.u32 %v1544_v21, 7 }
 0x38b   :  { %v1546_v23 = vsub.s32 0, %v2715_v22 }
 0x38c   :  { %v2398_v35 = vpop.eup %2397 }
 0x38d   :  { %2272 = vmatmul.mubr.msk.f32.vlgmr.msra.gmra.mrb[12].mxu1 %vm156_vm2, %v2398_v35  ;;  %v826_v37 = vsel %vm156_vm2, %v2398_v35, 0.0  ;;  %v1547_v25 = vrot.slane %v2721_v24, %v1546_v23 }
 0x38e   :  { %2280 = vmatpush3.msra.mxu1 %v1376_v36  ;;  %827 = vadd.xlane.f32.xlu0 %v826_v37 }
 0x38f   :  { %2281 = vmatprep.mubr.msk.f32.mxu1 %vm2479_vm1, %v2476_v10 }
 0x390   :  { %v2400_v38 = vpop.eup %2399 }
 0x391   :  { %2282 = vmatmul.mubr.msk.f32.vlgmr.msra.gmra.mrb[14].mxu1 %vm156_vm2, %v2400_v38  ;;  %v832_v39 = vsel %vm156_vm2, %v2400_v38, 0.0 }
 0x392   :  { %833 = vadd.xlane.f32.xlu0 %v832_v39 }
 0x3b6   :  { %v813_v42 = vpop.xlane.xlu0 %812 }
 0x3b7   :  { %2401 = vrcp.f32 %v813_v42 }
 0x3b8   :  { %2403 = vrcp.f32 %v816_v41 }
 0x3bc   :  { %v991_v43 = vpop.f32.mrb[8].mxu1 }
 0x3bd   :  { %v915_v44 = vpop.f32.mrb[10].mxu0  ;;  %v2253_v45 = vpop.f32.mrb[9].mxu1 }
 0x3be   :  { %v2248_v46 = vpop.f32.mrb[11].mxu0  ;;  %v1842_v45 = vld [vmem:[%s2806_s4 + $0x10] sm:$0xff] }
 0x3bf   :  { %v1843_v46 = vld [vmem:[%s2806_s4 + $0x18] sm:$0xff] }
 0x3c1   :  { %v2402_v10 = vpop.eup %2401 }
 0x3c2   :  { %v2404_v47 = vpop.eup %2403  ;;  %v1451_v48 = vmul.f32 %v2402_v10, %v915_v44  ;;  %v2346_v10 = vpack.c.bf16 %v1843_v46, %v1842_v45 }
 0x3c3   :  { %v1452_v49 = vmul.f32 %v2404_v47, %v991_v43  ;;  %v1841_v43 = vld [vmem:[%s2806_s4 + $0x8] sm:$0xff]  ;;  %v1934_v47 = vld [vmem:[%s2808_s6] sm:$0xff] }
 0x3c4   :  { %2286 = vmatprep.mubr.msk.f32.mxu0 %vm156_vm2, %v1451_v48  ;;  %v1935_v48 = vld [vmem:[%s2808_s6 + $0x8] sm:$0xff] }
 0x3c5   :  { %2287 = vmatmul.mubr.msk.f32.vlgmr.msra.gmra.mrb[18].mxu0 %vm156_vm2, %v1452_v49  ;;  %v2350_v49 = vpack.c.bf16 %v1935_v48, %v1934_v47  ;;  %v2058_v48 = vsub.s32 4, %v2715_v22 }
 0x3c6   :  { %2290 = vmatpush3.msra.mxu0 %v1460_v40 }
 0x3c7   :  { %2294 = vmatprep.subr.mxu0 %v1461_v50 }
 0x3e2   :  { %v825_v53 = vpop.xlane.xlu1 %824 }
 0x3e6   :  { %v831_v4 = vpop.xlane.xlu1 %830 }
 0x3e7   :  { %v819_v51 = vpop.xlane.xlu0 %818 }
 0x3e8   :  { %2405 = vrcp.f32 %v819_v51 }
 0x3eb   :  { %v822_v52 = vpop.xlane.xlu0 %821 }
 0x3ec   :  { %2407 = vrcp.f32 %v822_v52 }
 0x3ed   :  { %2409 = vrcp.f32 %v825_v53 }
 0x3f2   :  { %v2406_v56 = vpop.eup %2405 }
 0x3f6   :  { %v2408_v58 = vpop.eup %2407 }
 0x3f7   :  { %v2410_v63 = vpop.eup %2409 }
 0x41b   :  { %v828_v3 = vpop.xlane.xlu0 %827 }
 0x41c   :  { %2411 = vrcp.f32 %v828_v3  ;;  %v1937_v3 = vld [vmem:[%s2808_s6 + $0x18] sm:$0xff] }
 0x41d   :  { %2413 = vrcp.f32 %v831_v4 }
 0x41f   :  { %v834_v8 = vpop.xlane.xlu0 %833 }
 0x420   :  { %2415 = vrcp.f32 %v834_v8 }
 0x426   :  { %v2412_v11 = vpop.eup %2411 }
 0x427   :  { %v2414_v13 = vpop.eup %2413 }
 0x428   :  { %v1143_v54 = vpop.f32.mrb[10].mxu1 }
 0x429   :  { %v2263_v55 = vpop.f32.mrb[11].mxu1  ;;  %v1454_v61 = vmul.f32 %v2408_v58, %v1143_v54 }
 0x42a   :  { %v2416_v19 = vpop.eup %2415 }
 0x42c   :  { %v1067_v57 = vpop.f32.mrb[12].mxu0 }
 0x42d   :  { %v1453_v59 = vmul.f32 %v2406_v56, %v1067_v57  ;;  %v2258_v60 = vpop.f32.mrb[13].mxu0  ;;  %v1830_v56 = vsub.s32 1, %v2715_v22  ;;  %v1836_v57 = vsub.s32 2, %v2715_v22 }
 0x42f   :  { %2291 = vmatprep.mubr.msk.f32.mxu0 %vm156_vm2, %v1453_v59  ;;  %v1831_v58 = vrot.slane %v2721_v24, %v1830_v56 }
 0x430   :  { %v1219_v0 = vpop.f32.mrb[14].mxu0  ;;  %2292 = vmatmul.mubr.msk.f32.vlgmr.msra.gmra.mrb[18].mxu0 %vm156_vm2, %v1454_v61 }
 0x431   :  { %v1455_v1 = vmul.f32 %v2410_v63, %v1219_v0  ;;  %v2268_v2 = vpop.f32.mrb[15].mxu0  ;;  %2295 = vmatpush3.msra.mxu0 %v1461_v50  ;;  %v1837_v63 = vrot.slane %v2721_v24, %v1836_v57 }
 0x432   :  { %2299 = vmatprep.subr.mxu0 %v1462_v62  ;;  %v1936_v2 = vld [vmem:[%s2808_s6 + $0x10] sm:$0xff] }
 0x433   :  { %2296 = vmatprep.mubr.msk.f32.mxu0 %vm156_vm2, %v1455_v1  ;;  %v2354_v8 = vpack.c.bf16 %v1937_v3, %v1936_v2 }
 0x45a   :  { %v1371_v6 = vpop.f32.mrb[16].mxu0 }
 0x45b   :  { %v2278_v9 = vpop.f32.mrb[17].mxu0  ;;  %v1457_v16 = vmul.f32 %v2414_v13, %v1371_v6  ;;  %v1940_v13 = vld [vmem:[%s2808_s6 + $0x30] sm:$0xff] }
 0x45c   :  { %v1938_v9 = vld [vmem:[%s2808_s6 + $0x20] sm:$0xff] }
 0x460   :  { %v1295_v12 = vpop.f32.mrb[12].mxu1 }
 0x461   :  { %v1456_v14 = vmul.f32 %v2412_v11, %v1295_v12  ;;  %v2273_v15 = vpop.f32.mrb[13].mxu1  ;;  %v1939_v11 = vld [vmem:[%s2808_s6 + $0x28] sm:$0xff] }
 0x462   :  { %v2358_v12 = vpack.c.bf16 %v1939_v11, %v1938_v9 }
 0x463   :  { %2297 = vmatmul.mubr.msk.f32.vlgmr.msra.gmra.mrb[18].mxu0 %vm156_vm2, %v1456_v14  ;;  %v1941_v14 = vld [vmem:[%s2808_s6 + $0x38] sm:$0xff] }
 0x464   :  { %v1447_v17 = vpop.f32.mrb[14].mxu1  ;;  %2300 = vmatpush3.msra.mxu0 %v1462_v62  ;;  %2301 = vmatprep.mubr.msk.f32.mxu0 %vm156_vm2, %v1457_v16  ;;  %v2362_v15 = vpack.c.bf16 %v1941_v14, %v1940_v13  ;;  %v2122_v16 = vld [vmem:[%s2807_s5] ss:$0 sm:$0xff]  ;;  %s2483_s5 = smov [#allocation5]  }
 0x465   :  { %v2283_v18 = vpop.f32.mrb[15].mxu1  ;;  %v1458_v20 = vmul.f32 %v2416_v19, %v1447_v17  ;;  %s2075_s6 = sshll.u32 %s2483_s5, 4  ;;  %s2076_s6 = int_to_ptr.vmem [resolvable:$true] %s2075_s6 }
 0x466   :  { %s2447_s7 = scalar_lea.vmem %s2076_s6, 256  ;;  %p2452_p9 = scmp.lt.s32.totalorder %s2076_s6, %s2076_s6 }
 0x467   :  { %p2448_p8 = scmp.ne.s32.totalorder %s2076_s6, %s2447_s7  ;;  %p2453_p10 = scmp.lt.s32.totalorder %s2447_s7, %s2447_s7 }
 0x469   :  { %p2454_p11 = por %p2453_p10, %p2452_p9 }
 0x46b   :  { %2302 = vmatmul.mubr.msk.f32.vlgmr.msra.gmra.mrb[18].mxu0 %vm156_vm2, %v1458_v20  ;;  %p2455_p12 = pnand %p2454_p11, %p2448_p8 }
 0x53e   :  { %v2303_v26 = vpop.f32.mrb[18].mxu0 }
 0x53f   :  { %v2366_v27 = vadd.f32 %v2303_v26, %v1547_v25  ;;  %v1788_v28 = vpop.f32.mrb[19].mxu0 }
 0x540   :  { %v2367_v29 = vadd.f32 %v1788_v28, %v1547_v25  ;;  %v1944_v25 = vsub.s32 3, %v2715_v22 }
 0x541   :  { %v1800_v30 = vadd.f32 %v2366_v27, %v2560_v7 }
 0x542   :  { %v1799_v31 = vadd.f32 %v2367_v29, %v2556_v5  ;;  %v1840_v5 = vld [vmem:[%s2806_s4] sm:$0xff]  ;;  %v1945_v26 = vrot.slane %v2721_v24, %v1944_v25 }
 0x543   :  { %v1804_v32 = vsel %vm58_vm0, %v1800_v30, 0.0  ;;  %v2342_v44 = vpack.c.bf16 %v1841_v43, %v1840_v5 }
 0x544   :  { %1805 = vadd.xlane.f32.xlu0 %v1804_v32  ;;  %v1801_v33 = vsel %vm58_vm0, %v1799_v31, 0.0 }
 0x545   :  { %1802 = vadd.xlane.f32.xlu1 %v1801_v33  ;;  %2343 = vmatprep.subr.bf16.mxu1 %v2342_v44 }
 0x546   :  { %2345 = vmatpush3.bf16.msra.mxu1 %v2342_v44 }
 0x547   :  { %2347 = vmatprep.subr.bf16.mxu1 %v2346_v10 }
 0x54a   :  { %2349 = vmatpush3.bf16.msra.mxu1 %v2346_v10 }
 0x54b   :  { %2351 = vmatprep.subr.bf16.mxu1 %v2350_v49 }
 0x5d1   :  { %v1806_v34 = vpop.xlane.xlu0 %1805 }
 0x5d2   :  { %v1809_v35 = vmul.f32 0.03125, %v1806_v34  ;;  %v1803_v36 = vpop.xlane.xlu1 %1802 }
 0x5d3   :  { %v1808_v37 = vmul.f32 0.03125, %v1803_v36 }
 0x5d4   :  { %v1811_v38 = vsub.f32 %v1800_v30, %v1809_v35 }
 0x5d5   :  { %v1810_v39 = vsub.f32 %v1799_v31, %v1808_v37 }
 0x5d6   :  { %v1813_v40 = vmul.f32 %v1811_v38, %v1811_v38 }
 0x5d7   :  { %v1812_v41 = vmul.f32 %v1810_v39, %v1810_v39 }
 0x5d8   :  { %v1817_v42 = vsel %vm58_vm0, %v1813_v40, 0.0 }
 0x5d9   :  { %1818 = vadd.xlane.f32.xlu0 %v1817_v42  ;;  %v1814_v7 = vsel %vm58_vm0, %v1812_v41, 0.0 }
 0x5da   :  { %1815 = vadd.xlane.f32.xlu1 %v1814_v7 }
 0x666   :  { %v1819_v50 = vpop.xlane.xlu0 %1818 }
 0x667   :  { %v1821_v51 = vmul.f32 0.03125, %v1819_v50  ;;  %v1816_v52 = vpop.xlane.xlu1 %1815  ;;  %v2059_v50 = vrot.slane %v2721_v24, %v2058_v48 }
 0x668   :  { %v1820_v53 = vmul.f32 0.03125, %v1816_v52 }
 0x669   :  { %v1823_v54 = vadd.f32 1e-05, %v1821_v51 }
 0x66a   :  { %v1822_v55 = vadd.f32 1e-05, %v1820_v53 }
 0x66b   :  { %2417 = vrsqrt.f32 %v1823_v54 }
 0x66c   :  { %2419 = vrsqrt.f32 %v1822_v55 }
 0x675   :  { %v2418_v59 = vpop.eup %2417 }
 0x676   :  { %v2420_v60 = vpop.eup %2419  ;;  %v1827_v61 = vmul.f32 %v2418_v59, %v1811_v38 }
 0x677   :  { %v1826_v62 = vmul.f32 %v2420_v60, %v1810_v39 }
 0x678   :  { %v1833_v0 = vmul.f32 %v1831_v58, %v1827_v61 }
 0x679   :  { %v1832_v1 = vmul.f32 %v1831_v58, %v1826_v62 }
 0x67a   :  { %v1839_v6 = vadd.f32 %v1837_v63, %v1833_v0 }
 0x67b   :  { %v1838_v4 = vadd.f32 %v1837_v63, %v1832_v1 }
 0x67d   :  { %2312 = vmatprep.mubr.msk.f32.mxu1 %vm58_vm0, %v1838_v4 }
 0x67e   :  { %2313 = vmatmul.mubr.msk.f32.vlgmr.msra.gmra.mrb[16].mxu1 %vm58_vm0, %v1839_v6 }
 0x67f   :  { %2353 = vmatpush3.bf16.msra.mxu1 %v2350_v49  ;;  %v2064_v49 = vsub.s32 5, %v2715_v22 }
 0x680   :  { %2355 = vmatprep.subr.bf16.mxu1 %v2354_v8 }
 0x681   :  { %v2065_v54 = vrot.slane %v2721_v24, %v2064_v49 }
 0x683   :  { %2357 = vmatpush3.bf16.msra.mxu1 %v2354_v8 }
 0x684   :  { %2359 = vmatprep.subr.bf16.mxu1 %v2358_v12 }
 0x687   :  { %2361 = vmatpush3.bf16.msra.mxu1 %v2358_v12 }
 0x688   :  { %2363 = vmatprep.subr.bf16.mxu1 %v2362_v15 }
 0x68b   :  { %2365 = vmatpush3.bf16.msra.mxu1 %v2362_v15 }
 0x751   :  { %v2314_v17 = vpop.f32.mrb[16].mxu1 }
 0x752   :  { %v1929_v18 = vadd.f32 %v2314_v17, %v2122_v16  ;;  %v1923_v19 = vpop.f32.mrb[17].mxu1 }
 0x753   :  { %v1924_v20 = vadd.f32 %v2122_v16, %v1923_v19 }
 0x754   :  { %v1933_v23 = vmax.f32 %v1929_v18, 0.0 }
 0x755   :  { %v1932_v21 = vmax.f32 %v1924_v20, 0.0 }
 0x757   :  { %2331 = vmatprep.mubr.msk.f32.mxu1 %vm1946_vm3, %v1932_v21 }
 0x758   :  { %2332 = vmatmul.mubr.msk.f32.vlgmr.msra.gmra.mrb[18].mxu1 %vm1946_vm3, %v1933_v23 }
 0x82b   :  { %v2333_v27 = vpop.f32.mrb[18].mxu1 }
 0x82c   :  { %v2025_v28 = vadd.f32 %v2333_v27, %v1945_v26  ;;  %v2019_v29 = vpop.f32.mrb[19].mxu1 }
 0x82d   :  { %v2020_v30 = vadd.f32 %v2019_v29, %v1945_v26 }
 0x82e   :  { %v2029_v31 = vadd.f32 %v2025_v28, %v1839_v6 }
 0x82f   :  { %v2028_v32 = vadd.f32 %v2020_v30, %v1838_v4 }
 0x830   :  { %v2033_v33 = vsel %vm58_vm0, %v2029_v31, 0.0 }
 0x831   :  { %2034 = vadd.xlane.f32.xlu0 %v2033_v33  ;;  %v2030_v34 = vsel %vm58_vm0, %v2028_v32, 0.0 }
 0x832   :  { %2031 = vadd.xlane.f32.xlu1 %v2030_v34 }
 0x8be   :  { %v2035_v35 = vpop.xlane.xlu0 %2034 }
 0x8bf   :  { %v2037_v36 = vmul.f32 0.03125, %v2035_v35  ;;  %v2032_v37 = vpop.xlane.xlu1 %2031 }
 0x8c0   :  { %v2036_v38 = vmul.f32 0.03125, %v2032_v37 }
 0x8c1   :  { %v2039_v39 = vsub.f32 %v2029_v31, %v2037_v36 }
 0x8c2   :  { %v2038_v40 = vsub.f32 %v2028_v32, %v2036_v38 }
 0x8c3   :  { %v2041_v41 = vmul.f32 %v2039_v39, %v2039_v39 }
 0x8c4   :  { %v2040_v42 = vmul.f32 %v2038_v40, %v2038_v40 }
 0x8c5   :  { %v2045_v7 = vsel %vm58_vm0, %v2041_v41, 0.0 }
 0x8c6   :  { %2046 = vadd.xlane.f32.xlu0 %v2045_v7  ;;  %v2042_v5 = vsel %vm58_vm0, %v2040_v42, 0.0 }
 0x8c7   :  { %2043 = vadd.xlane.f32.xlu1 %v2042_v5 }
 0x953   :  { %v2047_v43 = vpop.xlane.xlu0 %2046 }
 0x954   :  { %v2049_v44 = vmul.f32 0.03125, %v2047_v43  ;;  %v2044_v45 = vpop.xlane.xlu1 %2043 }
 0x955   :  { %v2048_v46 = vmul.f32 0.03125, %v2044_v45 }
 0x956   :  { %v2051_v10 = vadd.f32 1e-05, %v2049_v44 }
 0x957   :  { %v2050_v47 = vadd.f32 1e-05, %v2048_v46 }
 0x958   :  { %2421 = vrsqrt.f32 %v2051_v10 }
 0x959   :  { %2423 = vrsqrt.f32 %v2050_v47 }
 0x962   :  { %v2422_v51 = vpop.eup %2421 }
 0x963   :  { %v2424_v52 = vpop.eup %2423  ;;  %v2055_v53 = vmul.f32 %v2422_v51, %v2039_v39 }
 0x964   :  { %v2054_v55 = vmul.f32 %v2424_v52, %v2038_v40 }
 0x965   :  { %v2061_v56 = vmul.f32 %v2059_v50, %v2055_v53 }
 0x966   :  { %v2060_v57 = vmul.f32 %v2059_v50, %v2054_v55 }
 0x967   :  { %v2067_v58 = vadd.f32 %v2065_v54, %v2061_v56 }
 0x968   :  { %v2066_v59 = vadd.f32 %v2065_v54, %v2060_v57 }
 0x969   :  { %2069 = vst.msk [vmem:[#allocation5 + $0x8] sm:$0xff] %vm58_vm0, %v2067_v58 }
 0x96a   :  { %2068 = vst.msk [vmem:[#allocation5] sm:$0xff] %vm58_vm0, %v2066_v59 }
 0x96b   :  { %2458 = shalt.err (!%p2455_p12)
}
 0x96c   :  { %s2459_s22 = scalar_lea.hbm %s2810_s8, 256 }
 0x96d   :  { %p2460_p13 = scmp.ne.s32.totalorder %s2810_s8, %s2459_s22  ;;  %p2463_p0 = scmp.lt.u32.totalorder %s2459_s22, %s2810_s8 }
 0x96f   :  { %p2465_p1 = pnand %p2463_p0, %p2460_p13 }
 0x971   :  { %2468 = shalt.err (!%p2465_p1)
}
 0x972   :  { %2081 = dma.vmem_to_hbm [thread:$0]  %s2076_s6, 256, %s2810_s8, [#allocation4], %s2474_s15, %s2474_s15, %s2475_s16  }
 0x973   :  { %2471 = dma.done.wait [#allocation4], 256  }
 0x974   :  { %2472 = vsyncadd [#allocation4], 4294967040 }
 0x975   :  { %2085 = vsyncpa [#allocation3], 1 }
 0x976   :  { %2086 = vsyncpa [#allocation4], 1 }

</bundles_post_ra>
